<compile_context>
chip_gen: v6e
topology: v6e:2x2x1
jax: 0.10.0
libtpu: 0.0.40
codegen_flags: <defaults>
</compile_context>

<pallas_src>
import jax
import jax.numpy as jnp
from jax.experimental import pallas as pl
from jax.experimental.pallas import tpu as pltpu

_LANE = 128


def _round_up(v, m):
    return ((v + m - 1) // m) * m


def _make_vpu_kernel(nb, cin, cout):
    """Small-channel path: unrolled scalar-weight FMAs on the VPU (exact f32)."""

    def kernel(x_ref, w_ref, b_ref, o_ref):
        # x_ref: (nb, cin, T) VMEM; w_ref: (cout, cin) SMEM f32; b_ref: (cout,) SMEM f32
        for n in range(nb):
            xb = x_ref[n].astype(jnp.float32)               # (cin, T)
            rows = []
            for o in range(cout):
                acc = xb[0:1, :] * w_ref[o, 0]
                for c in range(1, cin):
                    acc = acc + xb[c:c + 1, :] * w_ref[o, c]
                rows.append(jnp.maximum(acc + b_ref[o], 0.0))
            o_ref[n] = jnp.concatenate(rows, axis=0).astype(o_ref.dtype)

    return kernel


def _make_mxu_kernel(nb):
    """Large-channel path: MXU matmul per image at HIGHEST precision."""

    def kernel(x_ref, w_ref, b_ref, o_ref):
        # x_ref: (nb, Cin, T); w_ref: (Cout, Cin); b_ref: (Cout, 1) f32
        w = w_ref[...]
        b = b_ref[...]
        for n in range(nb):
            y = jnp.dot(w, x_ref[n],
                        preferred_element_type=jnp.float32,
                        precision=jax.lax.Precision.HIGHEST)   # f32-accurate
            o_ref[n] = jnp.maximum(y + b, 0.0).astype(o_ref.dtype)

    return kernel


def _choose_tiling(n, cin, cout, hw, itemsize, resident_w_bytes):
    """Budget-driven (Nb, tile_hw, grid) selection."""
    hw_padded = _round_up(hw, _LANE)
    bytes_per_col = (cin + cout) * itemsize                 # in + out bytes / spatial col

    # VMEM for double-buffered in/out tiles; keep total comfortably inside the
    # default scoped limits on every generation (v7x: 64 MiB phys / 32 MiB default).
    fixed_bytes = 2 * resident_w_bytes + 2 * cout * _LANE * 4
    tile_budget = max(2 * 1024 * 1024, 24 * 1024 * 1024 - fixed_bytes)
    max_cols = max(_LANE, tile_budget // (2 * bytes_per_col))

    # Aim for ~4 MiB of in+out traffic per grid step (>> ~0.35 us step overhead).
    target_cols = max(_LANE, (4 * 1024 * 1024) // bytes_per_col)
    cols_step = min(target_cols, max_cols)

    tile_hw = min(hw_padded, max(_LANE, (cols_step // _LANE) * _LANE))
    grid_hw = pl.cdiv(hw, tile_hw)

    # Fold several images into one step when one image's spatial extent is small.
    nb = 1
    if grid_hw == 1:
        nb = min(n, max(1, cols_step // max(tile_hw, 1)))
        while n % nb:
            nb -= 1

    # v7x has 2 TensorCores: make sure a "parallel" grid has >= 2 steps to shard.
    if (pl.cdiv(n, nb)) * grid_hw < 2:
        if hw_padded >= 2 * _LANE:
            tile_hw = max(_LANE, _round_up(hw_padded // 2, _LANE))
            grid_hw = pl.cdiv(hw, tile_hw)
        elif n >= 2:
            nb = max(1, n // 2)
            while n % nb:
                nb -= 1

    grid_n = pl.cdiv(n, nb)
    return nb, tile_hw, grid_n, grid_hw


@jax.jit
def conv1x1_relu(x_nchw, weight, bias):
    """x_nchw: (N, Cin, H, W); weight: (Cout, Cin, 1, 1); bias: (Cout,)."""
    N, Cin, H, W = x_nchw.shape
    Cout = weight.shape[0]
    HW = H * W
    itemsize = x_nchw.dtype.itemsize

    # Pure views — no data movement, no transposes.
    x_rows = x_nchw.reshape(N, Cin, HW)
    w_mat = weight.reshape(Cout, Cin)

    use_vpu = (Cin <= 8 and Cout <= 8)

    if use_vpu:
        # Weights/bias live in SMEM as f32 scalars -> no VMEM footprint.
        resident_w_bytes = 0
    else:
        resident_w_bytes = Cout * Cin * w_mat.dtype.itemsize

    nb, tile_hw, grid_n, grid_hw = _choose_tiling(
        N, Cin, Cout, HW, itemsize, resident_w_bytes)

    if use_vpu:
        kernel = _make_vpu_kernel(nb, Cin, Cout)
        w_arg = w_mat.astype(jnp.float32)
        b_arg = bias.astype(jnp.float32)
        w_spec = pl.BlockSpec(memory_space=pltpu.MemorySpace.SMEM)
        b_spec = pl.BlockSpec(memory_space=pltpu.MemorySpace.SMEM)
        resident_vmem = 0
    else:
        kernel = _make_mxu_kernel(nb)
        w_arg = w_mat
        b_arg = bias.astype(jnp.float32).reshape(Cout, 1)
        w_spec = pl.BlockSpec((Cout, Cin), lambda n, j: (0, 0))   # resident weights
        b_spec = pl.BlockSpec((Cout, 1), lambda n, j: (0, 0))     # resident bias
        resident_vmem = 2 * Cout * Cin * w_mat.dtype.itemsize + 2 * Cout * _LANE * 4

    # VMEM need: double-buffered in/out tiles + resident weights/bias.
    vmem_need = 2 * nb * (Cin + Cout) * tile_hw * itemsize + resident_vmem
    vmem_limit = int(min(max(vmem_need + vmem_need // 4 + (1 << 20),
                             16 * 1024 * 1024),
                         128 * 1024 * 1024))

    bytes_accessed = ((N * Cin * HW + N * Cout * HW) * itemsize
                      + Cout * Cin * 4 + Cout * 4)
    cost = pl.CostEstimate(flops=2 * N * Cout * Cin * HW,
                           transcendentals=0,
                           bytes_accessed=int(bytes_accessed))

    out = pl.pallas_call(
        kernel,
        out_shape=jax.ShapeDtypeStruct((N, Cout, HW), x_nchw.dtype),
        grid_spec=pltpu.PrefetchScalarGridSpec(
            num_scalar_prefetch=0,
            grid=(grid_n, grid_hw),
            in_specs=[
                pl.BlockSpec((nb, Cin, tile_hw), lambda n, j: (n, 0, j)),
                w_spec,
                b_spec,
            ],
            out_specs=pl.BlockSpec((nb, Cout, tile_hw), lambda n, j: (n, 0, j)),
        ),
        compiler_params=pltpu.CompilerParams(
            # Both axes fully independent -> shards across the two TensorCores
            # on v7x; neutral on v5e/v6e.
            dimension_semantics=("parallel", "parallel"),
            vmem_limit_bytes=vmem_limit,
        ),
        cost_estimate=cost,
    )(x_rows, w_arg, b_arg)

    return out.reshape(N, Cout, H, W)


if __name__ == "__main__":
    key = jax.random.PRNGKey(0)

    def run_case(n, cin, cout, h, w, tol):
        k1, k2, k3 = jax.random.split(jax.random.fold_in(key, cin), 3)
        x = jax.random.normal(k1, (n, cin, h, w), dtype=jnp.float32)
        weight = jax.random.normal(k2, (cout, cin, 1, 1), dtype=jnp.float32) * 0.1
        bias = jax.random.normal(k3, (cout,), dtype=jnp.float32) * 0.1

        out = conv1x1_relu(x, weight, bias)
        jax.block_until_ready(out)

        ref = jax.lax.conv_general_dilated(
            x, weight, window_strides=(1, 1), padding="VALID",
            dimension_numbers=("NCHW", "OIHW", "NCHW"),
            precision=jax.lax.Precision.HIGHEST,
        ) + bias.reshape(1, cout, 1, 1)
        ref = jnp.maximum(ref, 0.0)

        assert out.shape == (n, cout, h, w)
        err = float(jnp.max(jnp.abs(out - ref)))
        assert jnp.allclose(out, ref, atol=tol, rtol=tol), f"max abs err {err}"
        return out

    # Small-channel case (VPU scalar-FMA path), same shapes as before.
    run_case(2, 4, 4, 16, 16, tol=1e-5)
    # Module-default channel count 128 -> 128 (MXU path, HIGHEST precision).
    run_case(2, 128, 128, 16, 16, tol=1e-4)

    print("KERNEL_OK")
</pallas_src>

<mosaic_0001>
module attributes {stable_mosaic.version = 11 : i64} {
  func.func @kernel(%arg0: i32, %arg1: i32, %arg2: memref<2x4x128xf32, #tpu.memory_space<vmem>>, %arg3: memref<4x4xf32, #tpu.memory_space<smem>>, %arg4: memref<4xf32, #tpu.memory_space<smem>>, %arg5: memref<2x4x128xf32, #tpu.memory_space<vmem>>) attributes {dimension_semantics = [#tpu.dimension_semantics<parallel>, #tpu.dimension_semantics<parallel>], iteration_bounds = array<i64: 1, 2>, scalar_prefetch = 0 : i64, scratch_operands = 0 : i64, tpu.core_type = #tpu.core_type<tc>, window_params = [{transform_indices = @transform_0, window_bounds = array<i64: 2, 4, 128>}, {transform_indices = @transform_1, window_bounds = array<i64: 4, 4>}, {transform_indices = @transform_2, window_bounds = array<i64: 4>}, {transform_indices = @transform_3, window_bounds = array<i64: 2, 4, 128>}]} {
    %c0 = arith.constant 0 : index
    %c0_0 = arith.constant 0 : index
    %c0_1 = arith.constant 0 : index
    %0 = vector.load %arg2[%c0, %c0_0, %c0_1] : memref<2x4x128xf32, #tpu.memory_space<vmem>>, vector<1x4x128xf32>
    %1 = vector.shape_cast %0 : vector<1x4x128xf32> to vector<4x128xf32>
    %2 = vector.extract_strided_slice %1 {offsets = [0, 0], sizes = [1, 128], strides = [1, 1]} : vector<4x128xf32> to vector<1x128xf32>
    %c0_2 = arith.constant 0 : index
    %c0_3 = arith.constant 0 : index
    %3 = memref.load %arg3[%c0_2, %c0_3] : memref<4x4xf32, #tpu.memory_space<smem>>
    %4 = vector.broadcast %3 : f32 to vector<1x128xf32>
    %5 = arith.mulf %2, %4 : vector<1x128xf32>
    %6 = vector.extract_strided_slice %1 {offsets = [1, 0], sizes = [1, 128], strides = [1, 1]} : vector<4x128xf32> to vector<1x128xf32>
    %c0_4 = arith.constant 0 : index
    %c1 = arith.constant 1 : index
    %7 = memref.load %arg3[%c0_4, %c1] : memref<4x4xf32, #tpu.memory_space<smem>>
    %8 = vector.broadcast %7 : f32 to vector<1x128xf32>
    %9 = arith.mulf %6, %8 : vector<1x128xf32>
    %10 = arith.addf %5, %9 : vector<1x128xf32>
    %11 = vector.extract_strided_slice %1 {offsets = [2, 0], sizes = [1, 128], strides = [1, 1]} : vector<4x128xf32> to vector<1x128xf32>
    %c0_5 = arith.constant 0 : index
    %c2 = arith.constant 2 : index
    %12 = memref.load %arg3[%c0_5, %c2] : memref<4x4xf32, #tpu.memory_space<smem>>
    %13 = vector.broadcast %12 : f32 to vector<1x128xf32>
    %14 = arith.mulf %11, %13 : vector<1x128xf32>
    %15 = arith.addf %10, %14 : vector<1x128xf32>
    %16 = vector.extract_strided_slice %1 {offsets = [3, 0], sizes = [1, 128], strides = [1, 1]} : vector<4x128xf32> to vector<1x128xf32>
    %c0_6 = arith.constant 0 : index
    %c3 = arith.constant 3 : index
    %17 = memref.load %arg3[%c0_6, %c3] : memref<4x4xf32, #tpu.memory_space<smem>>
    %18 = vector.broadcast %17 : f32 to vector<1x128xf32>
    %19 = arith.mulf %16, %18 : vector<1x128xf32>
    %20 = arith.addf %15, %19 : vector<1x128xf32>
    %c0_7 = arith.constant 0 : index
    %21 = memref.load %arg4[%c0_7] : memref<4xf32, #tpu.memory_space<smem>>
    %22 = vector.broadcast %21 : f32 to vector<1x128xf32>
    %23 = arith.addf %20, %22 : vector<1x128xf32>
    %cst = arith.constant 0.000000e+00 : f32
    %24 = vector.broadcast %cst : f32 to vector<1x128xf32>
    %25 = arith.maximumf %23, %24 : vector<1x128xf32>
    %26 = vector.extract_strided_slice %1 {offsets = [0, 0], sizes = [1, 128], strides = [1, 1]} : vector<4x128xf32> to vector<1x128xf32>
    %c1_8 = arith.constant 1 : index
    %c0_9 = arith.constant 0 : index
    %27 = memref.load %arg3[%c1_8, %c0_9] : memref<4x4xf32, #tpu.memory_space<smem>>
    %28 = vector.broadcast %27 : f32 to vector<1x128xf32>
    %29 = arith.mulf %26, %28 : vector<1x128xf32>
    %30 = vector.extract_strided_slice %1 {offsets = [1, 0], sizes = [1, 128], strides = [1, 1]} : vector<4x128xf32> to vector<1x128xf32>
    %c1_10 = arith.constant 1 : index
    %c1_11 = arith.constant 1 : index
    %31 = memref.load %arg3[%c1_10, %c1_11] : memref<4x4xf32, #tpu.memory_space<smem>>
    %32 = vector.broadcast %31 : f32 to vector<1x128xf32>
    %33 = arith.mulf %30, %32 : vector<1x128xf32>
    %34 = arith.addf %29, %33 : vector<1x128xf32>
    %35 = vector.extract_strided_slice %1 {offsets = [2, 0], sizes = [1, 128], strides = [1, 1]} : vector<4x128xf32> to vector<1x128xf32>
    %c1_12 = arith.constant 1 : index
    %c2_13 = arith.constant 2 : index
    %36 = memref.load %arg3[%c1_12, %c2_13] : memref<4x4xf32, #tpu.memory_space<smem>>
    %37 = vector.broadcast %36 : f32 to vector<1x128xf32>
    %38 = arith.mulf %35, %37 : vector<1x128xf32>
    %39 = arith.addf %34, %38 : vector<1x128xf32>
    %40 = vector.extract_strided_slice %1 {offsets = [3, 0], sizes = [1, 128], strides = [1, 1]} : vector<4x128xf32> to vector<1x128xf32>
    %c1_14 = arith.constant 1 : index
    %c3_15 = arith.constant 3 : index
    %41 = memref.load %arg3[%c1_14, %c3_15] : memref<4x4xf32, #tpu.memory_space<smem>>
    %42 = vector.broadcast %41 : f32 to vector<1x128xf32>
    %43 = arith.mulf %40, %42 : vector<1x128xf32>
    %44 = arith.addf %39, %43 : vector<1x128xf32>
    %c1_16 = arith.constant 1 : index
    %45 = memref.load %arg4[%c1_16] : memref<4xf32, #tpu.memory_space<smem>>
    %46 = vector.broadcast %45 : f32 to vector<1x128xf32>
    %47 = arith.addf %44, %46 : vector<1x128xf32>
    %cst_17 = arith.constant 0.000000e+00 : f32
    %48 = vector.broadcast %cst_17 : f32 to vector<1x128xf32>
    %49 = arith.maximumf %47, %48 : vector<1x128xf32>
    %50 = vector.extract_strided_slice %1 {offsets = [0, 0], sizes = [1, 128], strides = [1, 1]} : vector<4x128xf32> to vector<1x128xf32>
    %c2_18 = arith.constant 2 : index
    %c0_19 = arith.constant 0 : index
    %51 = memref.load %arg3[%c2_18, %c0_19] : memref<4x4xf32, #tpu.memory_space<smem>>
    %52 = vector.broadcast %51 : f32 to vector<1x128xf32>
    %53 = arith.mulf %50, %52 : vector<1x128xf32>
    %54 = vector.extract_strided_slice %1 {offsets = [1, 0], sizes = [1, 128], strides = [1, 1]} : vector<4x128xf32> to vector<1x128xf32>
    %c2_20 = arith.constant 2 : index
    %c1_21 = arith.constant 1 : index
    %55 = memref.load %arg3[%c2_20, %c1_21] : memref<4x4xf32, #tpu.memory_space<smem>>
    %56 = vector.broadcast %55 : f32 to vector<1x128xf32>
    %57 = arith.mulf %54, %56 : vector<1x128xf32>
    %58 = arith.addf %53, %57 : vector<1x128xf32>
    %59 = vector.extract_strided_slice %1 {offsets = [2, 0], sizes = [1, 128], strides = [1, 1]} : vector<4x128xf32> to vector<1x128xf32>
    %c2_22 = arith.constant 2 : index
    %c2_23 = arith.constant 2 : index
    %60 = memref.load %arg3[%c2_22, %c2_23] : memref<4x4xf32, #tpu.memory_space<smem>>
    %61 = vector.broadcast %60 : f32 to vector<1x128xf32>
    %62 = arith.mulf %59, %61 : vector<1x128xf32>
    %63 = arith.addf %58, %62 : vector<1x128xf32>
    %64 = vector.extract_strided_slice %1 {offsets = [3, 0], sizes = [1, 128], strides = [1, 1]} : vector<4x128xf32> to vector<1x128xf32>
    %c2_24 = arith.constant 2 : index
    %c3_25 = arith.constant 3 : index
    %65 = memref.load %arg3[%c2_24, %c3_25] : memref<4x4xf32, #tpu.memory_space<smem>>
    %66 = vector.broadcast %65 : f32 to vector<1x128xf32>
    %67 = arith.mulf %64, %66 : vector<1x128xf32>
    %68 = arith.addf %63, %67 : vector<1x128xf32>
    %c2_26 = arith.constant 2 : index
    %69 = memref.load %arg4[%c2_26] : memref<4xf32, #tpu.memory_space<smem>>
    %70 = vector.broadcast %69 : f32 to vector<1x128xf32>
    %71 = arith.addf %68, %70 : vector<1x128xf32>
    %cst_27 = arith.constant 0.000000e+00 : f32
    %72 = vector.broadcast %cst_27 : f32 to vector<1x128xf32>
    %73 = arith.maximumf %71, %72 : vector<1x128xf32>
    %74 = vector.extract_strided_slice %1 {offsets = [0, 0], sizes = [1, 128], strides = [1, 1]} : vector<4x128xf32> to vector<1x128xf32>
    %c3_28 = arith.constant 3 : index
    %c0_29 = arith.constant 0 : index
    %75 = memref.load %arg3[%c3_28, %c0_29] : memref<4x4xf32, #tpu.memory_space<smem>>
    %76 = vector.broadcast %75 : f32 to vector<1x128xf32>
    %77 = arith.mulf %74, %76 : vector<1x128xf32>
    %78 = vector.extract_strided_slice %1 {offsets = [1, 0], sizes = [1, 128], strides = [1, 1]} : vector<4x128xf32> to vector<1x128xf32>
    %c3_30 = arith.constant 3 : index
    %c1_31 = arith.constant 1 : index
    %79 = memref.load %arg3[%c3_30, %c1_31] : memref<4x4xf32, #tpu.memory_space<smem>>
    %80 = vector.broadcast %79 : f32 to vector<1x128xf32>
    %81 = arith.mulf %78, %80 : vector<1x128xf32>
    %82 = arith.addf %77, %81 : vector<1x128xf32>
    %83 = vector.extract_strided_slice %1 {offsets = [2, 0], sizes = [1, 128], strides = [1, 1]} : vector<4x128xf32> to vector<1x128xf32>
    %c3_32 = arith.constant 3 : index
    %c2_33 = arith.constant 2 : index
    %84 = memref.load %arg3[%c3_32, %c2_33] : memref<4x4xf32, #tpu.memory_space<smem>>
    %85 = vector.broadcast %84 : f32 to vector<1x128xf32>
    %86 = arith.mulf %83, %85 : vector<1x128xf32>
    %87 = arith.addf %82, %86 : vector<1x128xf32>
    %88 = vector.extract_strided_slice %1 {offsets = [3, 0], sizes = [1, 128], strides = [1, 1]} : vector<4x128xf32> to vector<1x128xf32>
    %c3_34 = arith.constant 3 : index
    %c3_35 = arith.constant 3 : index
    %89 = memref.load %arg3[%c3_34, %c3_35] : memref<4x4xf32, #tpu.memory_space<smem>>
    %90 = vector.broadcast %89 : f32 to vector<1x128xf32>
    %91 = arith.mulf %88, %90 : vector<1x128xf32>
    %92 = arith.addf %87, %91 : vector<1x128xf32>
    %c3_36 = arith.constant 3 : index
    %93 = memref.load %arg4[%c3_36] : memref<4xf32, #tpu.memory_space<smem>>
    %94 = vector.broadcast %93 : f32 to vector<1x128xf32>
    %95 = arith.addf %92, %94 : vector<1x128xf32>
    %cst_37 = arith.constant 0.000000e+00 : f32
    %96 = vector.broadcast %cst_37 : f32 to vector<1x128xf32>
    %97 = arith.maximumf %95, %96 : vector<1x128xf32>
    %98 = tpu.concatenate %25, %49, %73, %97 in 0 : vector<1x128xf32>, vector<1x128xf32>, vector<1x128xf32>, vector<1x128xf32> -> vector<4x128xf32>
    %c0_38 = arith.constant 0 : index
    %c0_39 = arith.constant 0 : index
    %c0_40 = arith.constant 0 : index
    %99 = vector.load %arg5[%c0_38, %c0_39, %c0_40] : memref<2x4x128xf32, #tpu.memory_space<vmem>>, vector<1x4x128xf32>
    %100 = vector.shape_cast %99 : vector<1x4x128xf32> to vector<4x128xf32>
    %101 = vector.shape_cast %98 : vector<4x128xf32> to vector<1x4x128xf32>
    tpu.vector_store %arg5[%c0_38, %c0_39, %c0_40], %101 {strides = array<i32>} : memref<2x4x128xf32, #tpu.memory_space<vmem>>, vector<1x4x128xf32>,
    %c1_41 = arith.constant 1 : index
    %c0_42 = arith.constant 0 : index
    %c0_43 = arith.constant 0 : index
    %102 = vector.load %arg2[%c1_41, %c0_42, %c0_43] : memref<2x4x128xf32, #tpu.memory_space<vmem>>, vector<1x4x128xf32>
    %103 = vector.shape_cast %102 : vector<1x4x128xf32> to vector<4x128xf32>
    %104 = vector.extract_strided_slice %103 {offsets = [0, 0], sizes = [1, 128], strides = [1, 1]} : vector<4x128xf32> to vector<1x128xf32>
    %c0_44 = arith.constant 0 : index
    %c0_45 = arith.constant 0 : index
    %105 = memref.load %arg3[%c0_44, %c0_45] : memref<4x4xf32, #tpu.memory_space<smem>>
    %106 = vector.broadcast %105 : f32 to vector<1x128xf32>
    %107 = arith.mulf %104, %106 : vector<1x128xf32>
    %108 = vector.extract_strided_slice %103 {offsets = [1, 0], sizes = [1, 128], strides = [1, 1]} : vector<4x128xf32> to vector<1x128xf32>
    %c0_46 = arith.constant 0 : index
    %c1_47 = arith.constant 1 : index
    %109 = memref.load %arg3[%c0_46, %c1_47] : memref<4x4xf32, #tpu.memory_space<smem>>
    %110 = vector.broadcast %109 : f32 to vector<1x128xf32>
    %111 = arith.mulf %108, %110 : vector<1x128xf32>
    %112 = arith.addf %107, %111 : vector<1x128xf32>
    %113 = vector.extract_strided_slice %103 {offsets = [2, 0], sizes = [1, 128], strides = [1, 1]} : vector<4x128xf32> to vector<1x128xf32>
    %c0_48 = arith.constant 0 : index
    %c2_49 = arith.constant 2 : index
    %114 = memref.load %arg3[%c0_48, %c2_49] : memref<4x4xf32, #tpu.memory_space<smem>>
    %115 = vector.broadcast %114 : f32 to vector<1x128xf32>
    %116 = arith.mulf %113, %115 : vector<1x128xf32>
    %117 = arith.addf %112, %116 : vector<1x128xf32>
    %118 = vector.extract_strided_slice %103 {offsets = [3, 0], sizes = [1, 128], strides = [1, 1]} : vector<4x128xf32> to vector<1x128xf32>
    %c0_50 = arith.constant 0 : index
    %c3_51 = arith.constant 3 : index
    %119 = memref.load %arg3[%c0_50, %c3_51] : memref<4x4xf32, #tpu.memory_space<smem>>
    %120 = vector.broadcast %119 : f32 to vector<1x128xf32>
    %121 = arith.mulf %118, %120 : vector<1x128xf32>
    %122 = arith.addf %117, %121 : vector<1x128xf32>
    %c0_52 = arith.constant 0 : index
    %123 = memref.load %arg4[%c0_52] : memref<4xf32, #tpu.memory_space<smem>>
    %124 = vector.broadcast %123 : f32 to vector<1x128xf32>
    %125 = arith.addf %122, %124 : vector<1x128xf32>
    %cst_53 = arith.constant 0.000000e+00 : f32
    %126 = vector.broadcast %cst_53 : f32 to vector<1x128xf32>
    %127 = arith.maximumf %125, %126 : vector<1x128xf32>
    %128 = vector.extract_strided_slice %103 {offsets = [0, 0], sizes = [1, 128], strides = [1, 1]} : vector<4x128xf32> to vector<1x128xf32>
    %c1_54 = arith.constant 1 : index
    %c0_55 = arith.constant 0 : index
    %129 = memref.load %arg3[%c1_54, %c0_55] : memref<4x4xf32, #tpu.memory_space<smem>>
    %130 = vector.broadcast %129 : f32 to vector<1x128xf32>
    %131 = arith.mulf %128, %130 : vector<1x128xf32>
    %132 = vector.extract_strided_slice %103 {offsets = [1, 0], sizes = [1, 128], strides = [1, 1]} : vector<4x128xf32> to vector<1x128xf32>
    %c1_56 = arith.constant 1 : index
    %c1_57 = arith.constant 1 : index
    %133 = memref.load %arg3[%c1_56, %c1_57] : memref<4x4xf32, #tpu.memory_space<smem>>
    %134 = vector.broadcast %133 : f32 to vector<1x128xf32>
    %135 = arith.mulf %132, %134 : vector<1x128xf32>
    %136 = arith.addf %131, %135 : vector<1x128xf32>
    %137 = vector.extract_strided_slice %103 {offsets = [2, 0], sizes = [1, 128], strides = [1, 1]} : vector<4x128xf32> to vector<1x128xf32>
    %c1_58 = arith.constant 1 : index
    %c2_59 = arith.constant 2 : index
    %138 = memref.load %arg3[%c1_58, %c2_59] : memref<4x4xf32, #tpu.memory_space<smem>>
    %139 = vector.broadcast %138 : f32 to vector<1x128xf32>
    %140 = arith.mulf %137, %139 : vector<1x128xf32>
    %141 = arith.addf %136, %140 : vector<1x128xf32>
    %142 = vector.extract_strided_slice %103 {offsets = [3, 0], sizes = [1, 128], strides = [1, 1]} : vector<4x128xf32> to vector<1x128xf32>
    %c1_60 = arith.constant 1 : index
    %c3_61 = arith.constant 3 : index
    %143 = memref.load %arg3[%c1_60, %c3_61] : memref<4x4xf32, #tpu.memory_space<smem>>
    %144 = vector.broadcast %143 : f32 to vector<1x128xf32>
    %145 = arith.mulf %142, %144 : vector<1x128xf32>
    %146 = arith.addf %141, %145 : vector<1x128xf32>
    %c1_62 = arith.constant 1 : index
    %147 = memref.load %arg4[%c1_62] : memref<4xf32, #tpu.memory_space<smem>>
    %148 = vector.broadcast %147 : f32 to vector<1x128xf32>
    %149 = arith.addf %146, %148 : vector<1x128xf32>
    %cst_63 = arith.constant 0.000000e+00 : f32
    %150 = vector.broadcast %cst_63 : f32 to vector<1x128xf32>
    %151 = arith.maximumf %149, %150 : vector<1x128xf32>
    %152 = vector.extract_strided_slice %103 {offsets = [0, 0], sizes = [1, 128], strides = [1, 1]} : vector<4x128xf32> to vector<1x128xf32>
    %c2_64 = arith.constant 2 : index
    %c0_65 = arith.constant 0 : index
    %153 = memref.load %arg3[%c2_64, %c0_65] : memref<4x4xf32, #tpu.memory_space<smem>>
    %154 = vector.broadcast %153 : f32 to vector<1x128xf32>
    %155 = arith.mulf %152, %154 : vector<1x128xf32>
    %156 = vector.extract_strided_slice %103 {offsets = [1, 0], sizes = [1, 128], strides = [1, 1]} : vector<4x128xf32> to vector<1x128xf32>
    %c2_66 = arith.constant 2 : index
    %c1_67 = arith.constant 1 : index
    %157 = memref.load %arg3[%c2_66, %c1_67] : memref<4x4xf32, #tpu.memory_space<smem>>
    %158 = vector.broadcast %157 : f32 to vector<1x128xf32>
    %159 = arith.mulf %156, %158 : vector<1x128xf32>
    %160 = arith.addf %155, %159 : vector<1x128xf32>
    %161 = vector.extract_strided_slice %103 {offsets = [2, 0], sizes = [1, 128], strides = [1, 1]} : vector<4x128xf32> to vector<1x128xf32>
    %c2_68 = arith.constant 2 : index
    %c2_69 = arith.constant 2 : index
    %162 = memref.load %arg3[%c2_68, %c2_69] : memref<4x4xf32, #tpu.memory_space<smem>>
    %163 = vector.broadcast %162 : f32 to vector<1x128xf32>
    %164 = arith.mulf %161, %163 : vector<1x128xf32>
    %165 = arith.addf %160, %164 : vector<1x128xf32>
    %166 = vector.extract_strided_slice %103 {offsets = [3, 0], sizes = [1, 128], strides = [1, 1]} : vector<4x128xf32> to vector<1x128xf32>
    %c2_70 = arith.constant 2 : index
    %c3_71 = arith.constant 3 : index
    %167 = memref.load %arg3[%c2_70, %c3_71] : memref<4x4xf32, #tpu.memory_space<smem>>
    %168 = vector.broadcast %167 : f32 to vector<1x128xf32>
    %169 = arith.mulf %166, %168 : vector<1x128xf32>
    %170 = arith.addf %165, %169 : vector<1x128xf32>
    %c2_72 = arith.constant 2 : index
    %171 = memref.load %arg4[%c2_72] : memref<4xf32, #tpu.memory_space<smem>>
    %172 = vector.broadcast %171 : f32 to vector<1x128xf32>
    %173 = arith.addf %170, %172 : vector<1x128xf32>
    %cst_73 = arith.constant 0.000000e+00 : f32
    %174 = vector.broadcast %cst_73 : f32 to vector<1x128xf32>
    %175 = arith.maximumf %173, %174 : vector<1x128xf32>
    %176 = vector.extract_strided_slice %103 {offsets = [0, 0], sizes = [1, 128], strides = [1, 1]} : vector<4x128xf32> to vector<1x128xf32>
    %c3_74 = arith.constant 3 : index
    %c0_75 = arith.constant 0 : index
    %177 = memref.load %arg3[%c3_74, %c0_75] : memref<4x4xf32, #tpu.memory_space<smem>>
    %178 = vector.broadcast %177 : f32 to vector<1x128xf32>
    %179 = arith.mulf %176, %178 : vector<1x128xf32>
    %180 = vector.extract_strided_slice %103 {offsets = [1, 0], sizes = [1, 128], strides = [1, 1]} : vector<4x128xf32> to vector<1x128xf32>
    %c3_76 = arith.constant 3 : index
    %c1_77 = arith.constant 1 : index
    %181 = memref.load %arg3[%c3_76, %c1_77] : memref<4x4xf32, #tpu.memory_space<smem>>
    %182 = vector.broadcast %181 : f32 to vector<1x128xf32>
    %183 = arith.mulf %180, %182 : vector<1x128xf32>
    %184 = arith.addf %179, %183 : vector<1x128xf32>
    %185 = vector.extract_strided_slice %103 {offsets = [2, 0], sizes = [1, 128], strides = [1, 1]} : vector<4x128xf32> to vector<1x128xf32>
    %c3_78 = arith.constant 3 : index
    %c2_79 = arith.constant 2 : index
    %186 = memref.load %arg3[%c3_78, %c2_79] : memref<4x4xf32, #tpu.memory_space<smem>>
    %187 = vector.broadcast %186 : f32 to vector<1x128xf32>
    %188 = arith.mulf %185, %187 : vector<1x128xf32>
    %189 = arith.addf %184, %188 : vector<1x128xf32>
    %190 = vector.extract_strided_slice %103 {offsets = [3, 0], sizes = [1, 128], strides = [1, 1]} : vector<4x128xf32> to vector<1x128xf32>
    %c3_80 = arith.constant 3 : index
    %c3_81 = arith.constant 3 : index
    %191 = memref.load %arg3[%c3_80, %c3_81] : memref<4x4xf32, #tpu.memory_space<smem>>
    %192 = vector.broadcast %191 : f32 to vector<1x128xf32>
    %193 = arith.mulf %190, %192 : vector<1x128xf32>
    %194 = arith.addf %189, %193 : vector<1x128xf32>
    %c3_82 = arith.constant 3 : index
    %195 = memref.load %arg4[%c3_82] : memref<4xf32, #tpu.memory_space<smem>>
    %196 = vector.broadcast %195 : f32 to vector<1x128xf32>
    %197 = arith.addf %194, %196 : vector<1x128xf32>
    %cst_83 = arith.constant 0.000000e+00 : f32
    %198 = vector.broadcast %cst_83 : f32 to vector<1x128xf32>
    %199 = arith.maximumf %197, %198 : vector<1x128xf32>
    %200 = tpu.concatenate %127, %151, %175, %199 in 0 : vector<1x128xf32>, vector<1x128xf32>, vector<1x128xf32>, vector<1x128xf32> -> vector<4x128xf32>
    %c1_84 = arith.constant 1 : index
    %c0_85 = arith.constant 0 : index
    %c0_86 = arith.constant 0 : index
    %201 = vector.load %arg5[%c1_84, %c0_85, %c0_86] : memref<2x4x128xf32, #tpu.memory_space<vmem>>, vector<1x4x128xf32>
    %202 = vector.shape_cast %201 : vector<1x4x128xf32> to vector<4x128xf32>
    %203 = vector.shape_cast %200 : vector<4x128xf32> to vector<1x4x128xf32>
    tpu.vector_store %arg5[%c1_84, %c0_85, %c0_86], %203 {strides = array<i32>} : memref<2x4x128xf32, #tpu.memory_space<vmem>>, vector<1x4x128xf32>,
    return
  }
  func.func @transform_0(%arg0: i32, %arg1: i32) -> (i32, i32, i32) {
    %c0_i32 = arith.constant 0 : i32
    %c0_i32_0 = arith.constant 0 : i32
    return %arg0, %c0_i32, %arg1 : i32, i32, i32
  }
  func.func @transform_1(%arg0: i32, %arg1: i32) -> (i32, i32) {
    %c0_i32 = arith.constant 0 : i32
    %c0_i32_0 = arith.constant 0 : i32
    %c0_i32_1 = arith.constant 0 : i32
    return %c0_i32, %c0_i32_0 : i32, i32
  }
  func.func @transform_2(%arg0: i32, %arg1: i32) -> i32 {
    %c0_i32 = arith.constant 0 : i32
    %c0_i32_0 = arith.constant 0 : i32
    return %c0_i32 : i32
  }
  func.func @transform_3(%arg0: i32, %arg1: i32) -> (i32, i32, i32) {
    %c0_i32 = arith.constant 0 : i32
    %c0_i32_0 = arith.constant 0 : i32
    return %arg0, %c0_i32, %arg1 : i32, i32, i32
  }
}

</mosaic_0001>

<bundles_post_ra>
// kernel: conv1x1_relu.1
= control target key start
LH: loop header
LB: loop body
LE: loop exit
PB: predicated region body
PF: predicated region fallthrough
CT: control target
= control target key end

     0   :  { %8 = vsyncpa [#allocation4], 0  ;;  %s1094_s0 = inlined_call_operand.vmem [shape: f32[2,4,256], index: 0, kind: input, shape index: {}]   ;;  %s1095_s1 = inlined_call_operand.vmem [shape: f32[4,4], index: 1, kind: input, shape index: {}]   ;;  %s1096_s2 = inlined_call_operand.vmem [shape: f32[4], index: 2, kind: input, shape index: {}]   ;;  %s1097_s3 = inlined_call_operand.vmem [shape: f32[2,4,256], index: 3, kind: output, shape index: {}]  }
   0x1   :  { %9 = vsyncpa [#allocation6], 0  ;;  %s881_s12 = smov 0   ;;  %s883_s13 = smov 0  }
   0x2   :  { %s885_s14 = smov 0   ;;  %s887_s15 = smov 0  }
   0x3   :  { %s889_s16 = smov 0  }
   0x4 LB: > { %s665_s17 = sadd.s32 4294967295, %s857_s16   ;;  %s24_s18 = sadd.s32 1, %s853_s15  ;;  %s857_s16 = sphi %s889_s16, %s15_s16   ;;  %s853_s15 = sphi %s887_s15, %s1113_s15   ;;  %s849_s14 = sphi %s885_s14, %s1112_s14   ;;  %s845_s13 = sphi %s883_s13, %s1111_s13   ;;  %s841_s12 = sphi %s881_s12, %s1110_s12  }
   0x5   : > { %p25_p0 = scmp.ge.s32.totalorder %s24_s18, 2  ;;  %s36_s19 = sadd.s32 1, %s845_s13 }
   0x6   : > { %p43_p1 = scmp.ne.s32.totalorder %s845_s13, %s841_s12  ;;  %p44_p2 = scmp.eq.s32.totalorder %s857_s16, 0 }
   0x7   : > { %s1115_s18 = smov (%p25_p0, %s24_s18), 0  ;;  %p117_p4 = scmp.eq.s32.totalorder %s665_s17, 1 }
   0x8   : > { %p914_p3 = por %p44_p2, %p43_p1  ;;  %s32_s21 = ssub.s32 %s853_s15, %s1115_s18 }
   0x9   : > { %p667_p5 = scmp.ge.s32.totalorder %s857_s16, 1  ;;  %p34_p6 = scmp.eq.s32.totalorder %s32_s21, 0 }
   0xa   : > { %s1101_s20 = scalar_select %p914_p3, 1, 0 }
   0xb   : > { %p921_p7 = por %p117_p4, %p43_p1  ;;  %p130_p8 = scmp.lt.s32.totalorder %s857_s16, 3 }
   0xc   : > { %s927_s23 = scalar_select %p34_p6, %s845_s13, %s36_s19  }
   0xd   : > { %s1102_s22 = scalar_select %p921_p7, 1, 0 }
   0xe   : > { %p929_p9 = pnand %p667_p5, %p130_p8  ;;  %p933_p10 = scmp.eq.s32.totalorder %s665_s17, 0 }
   0xf   : > { %s143_s28 = sshll.u32 %s1095_s1, 4  ;;  %s154_s4 = sshll.u32 %s1096_s2, 4  ;;  %s144_s28 = int_to_ptr.vmem [resolvable:$true] %s143_s28  ;;  %s155_s4 = int_to_ptr.vmem [resolvable:$true] %s154_s4 }
  0x10   : > { %s1103_s24 = scalar_select %p929_p9, 1, 0 }
  0x11   : > { %s1104_s25 = scalar_select %p933_p10, 1, 0 }
  0x12   : > { %p728_p11 = pneg %p929_p9  ;;  %s781_s6 = scalar_lea.vmem %s144_s28, 64 }
  0x13   : > { %p782_p13 = scmp.ne.s32.totalorder %s144_s28, %s781_s6  ;;  %p789_p4 = scmp.lt.s32.totalorder %s144_s28, %s144_s28 }
  0x14   : > { %p947_p12 = pnand %p933_p10, %p728_p11  ;;  %p790_p5 = scmp.lt.s32.totalorder %s781_s6, %s781_s6 }
  0x16   : > { %p783_p0 = pneg %p947_p12  ;;  %p791_p6 = por %p790_p5, %p789_p4 }
  0x18   : > { %p784_p1 = pnand %p783_p0, %p782_p13 }
  0x1a   : > { %p785_p2 = pneg %p784_p1 }
  0x1c   : > { %p792_p8 = pnand %p791_p6, %p785_p2 }
  0x1e   : > { %795 = shalt.err (!%p792_p8)
}
  0x1f   : > { %s859_s7 = smov [#allocation3]   ;;  %s796_s8 = scalar_lea.vmem %s155_s4, 16 }
  0x20   : > { %731 = dma.vmem_to_smem (!%p947_p12), %s144_s28, 64, %s859_s7, [#allocation4]  }
  0x21   : > { %p797_p11 = scmp.ne.s32.totalorder %s155_s4, %s796_s8  ;;  %p804_p9 = scmp.lt.s32.totalorder %s155_s4, %s155_s4 }
  0x22   : > { %p805_p3 = scmp.lt.s32.totalorder %s796_s8, %s796_s8 }
  0x23   : > { %p799_p7 = pnand %p797_p11, %p783_p0 }
  0x24   : > { %p806_p13 = por %p805_p3, %p804_p9 }
  0x25   : > { %p800_p10 = pneg %p799_p7 }
  0x27   : > { %p807_p1 = pnand %p806_p13, %p800_p10 }
  0x29   : > { %810 = shalt.err (!%p807_p1)
}
  0x2a   : > { %s860_s9 = smov [#allocation5]   ;;  %p670_p2 = scmp.ge.s32.totalorder %s857_s16, 2 }
  0x2b   : > { %734 = dma.vmem_to_smem (!%p947_p12), %s155_s4, 16, %s860_s9, [#allocation6]  }
  0x2c   : > { %161 = sbr.rel (%p670_p2) target bundleno = 54 (0x36), region = 24  ;;  %p1106_p4 = scmp.ne.s32.totalorder (!%p670_p2), %s1101_s20, 0 }
  0x31   : > { %164 = sbr.rel (!%p1106_p4) target bundleno = 54 (0x36), region = 28  ;;  %s166_s10 = sand.u32 (%p1106_p4), 1, %s845_s13  }
  0x32   : > { %s672_s11 = sshll.u32 (%p1106_p4), %s853_s15, 2  ;;  %s671_s17 = sshll.u32 (%p1106_p4), %s166_s10, 3 }
  0x33   : > { %s173_s26 = scalar_lea.vmem (%p1106_p4), %s1094_s0, %s672_s11  ;;  %s168_s27 = scalar_lea.vmem (%p1106_p4), [#allocation2], %s671_s17 }
  0x34   : > { %v190_v0 = vld [vmem:[%s173_s26] sm:$0xf] (%p1106_p4)  ;;  %v192_v1 = vld [vmem:[%s173_s26 + $0x8] sm:$0xf] (%p1106_p4) }
  0x35   : > { %191 = vst [vmem:[%s168_s27] sm:$0xf] (%p1106_p4), %v190_v0  ;;  %193 = vst [vmem:[%s168_s27 + $0x4] sm:$0xf] (%p1106_p4), %v192_v1 }
  0x36 PF: > { %p1107_p3 = scmp.ne.s32.totalorder %s1103_s24, 0 }
  0x37   : > { %s227_s20 = sand.u32 (!%p1107_p3), 1, %s841_s12   ;;  %p1108_p7 = scmp.ne.s32.totalorder (!%p1107_p3), %s1104_s25, 0 }
  0x38   : > { %224 = sbr.rel (%p1107_p3) target bundleno = 122 (0x7a), region = 69  ;;  %s968_s28 = sshll.u32 (!%p1107_p3), %s227_s20, 3 }
  0x39   : > { %s229_s29 = scalar_lea.vmem (!%p1107_p3), [#allocation2], %s968_s28 }
  0x3d   : > { %832 = dma.done.wait (%p1108_p7), [#allocation4], 64  }
  0x3e   : > { %834 = vsyncadd (%p1108_p7), [#allocation4], 4294967232 }
  0x3f   : > { %836 = dma.done.wait (%p1108_p7), [#allocation6], 16  }
  0x40   : > { %838 = vsyncadd (%p1108_p7), [#allocation6], 4294967280 }
  0x41   : > { %241 = sfence }
  0x42   : > { %s261_s24 = sld [smem:[#allocation3]]  ;;  %v985_v3 = vld [vmem:[%s229_s29] sm:$0xf]  ;;  %v989_v5 = vld [vmem:[%s229_s29 + $0x4] sm:$0xf]  ;;  %vm382_vm0 = vcmask 1040384  }
  0x43   : > { %s678_s30 = sld [smem:[#allocation3 + $0x1]]  ;;  %vm384_vm1 = vcmask 1041408   ;;  %vm386_vm2 = vcmask 1042432   ;;  %p1109_p9 = scmp.ne.s32.totalorder %s1102_s22, 0 }
  0x44   : > { %s679_s4 = sld [smem:[#allocation3 + $0x2]] }
  0x45   : > { %s680_s12 = sld [smem:[#allocation3 + $0x3]] }
  0x46   : > { %s979_s5 = sld [smem:[#allocation5]] }
  0x47   : > { %s981_s6 = sld [smem:[#allocation3 + $0x80]] }
  0x48   : > { %v262_v2 = vstv %s261_s24  ;;  %s983_s7 = sld [smem:[#allocation3 + $0x81]] }
  0x49   : > { %v265_v4 = vstv %s678_s30  ;;  %s987_s8 = sld [smem:[#allocation3 + $0x82]]  ;;  %v263_v6 = vmul.f32 %v262_v2, %v985_v3  ;;  %v393_v12 = vmul.f32 %v989_v5, %v262_v2  ;;  %s257_s30 = scalar_lea.vmem [#allocation7], %s968_s28 }
  0x4a   : > { %v266_v7 = vmul.f32 %v265_v4, %v985_v3  ;;  %v272_v8 = vstv %s679_s4  ;;  %s993_s25 = sld [smem:[#allocation3 + $0x83]]  ;;  %v396_v9 = vmul.f32 %v989_v5, %v265_v4  ;;  %s717_s4 = sshll.u32 (%p1109_p9), %s849_s14, 2 }
  0x4b   : > { %v273_v10 = vmul.f32 %v272_v8, %v985_v3  ;;  %v279_v11 = vstv %s680_s12  ;;  %s997_s9 = sld [smem:[#allocation5 + $0x1]]  ;;  %v403_v13 = vmul.f32 %v989_v5, %v272_v8 }
  0x4c   : > { %v268_v14 = vrot.slane %v266_v7, 1  ;;  %v280_v15 = vmul.f32 %v279_v11, %v985_v3  ;;  %s1002_s10 = sld [smem:[#allocation3 + $0x100]]  ;;  %v398_v16 = vrot.slane %v396_v9, 1  ;;  %v410_v20 = vmul.f32 %v989_v5, %v279_v11 }
  0x4d   : > { %v275_v17 = vrot.slane %v273_v10, 2  ;;  %v290_v18 = vstv %s981_s6  ;;  %s1005_s11 = sld [smem:[#allocation3 + $0x101]]  ;;  %v405_v19 = vrot.slane %v403_v13, 2  ;;  %v286_v29 = vstv %s979_s5  ;;  %s528_s5 = scalar_lea.vmem (%p1109_p9), %s1097_s3, %s717_s4 }
  0x4e   : > { %v270_v21 = vadd.f32 %v268_v14, %v263_v6  ;;  %v282_v22 = vrot.slane %v280_v15, 3  ;;  %v293_v23 = vstv %s983_s7  ;;  %s1009_s17 = sld [smem:[#allocation3 + $0x102]]  ;;  %v291_v24 = vmul.f32 %v290_v18, %v985_v3 }
  0x4f   : > { %v294_v25 = vmul.f32 %v293_v23, %v985_v3  ;;  %v300_v26 = vstv %s987_s8  ;;  %s1014_s19 = sld [smem:[#allocation3 + $0x103]]  ;;  %v400_v27 = vadd.f32 %v398_v16, %v393_v12  ;;  %v412_v35 = vrot.slane %v410_v20, 3 }
  0x50   : > { %v277_v28 = vadd.f32 %v275_v17, %v270_v21  ;;  %v301_v30 = vmul.f32 %v300_v26, %v985_v3  ;;  %v307_v31 = vstv %s993_s25  ;;  %s1019_s21 = sld [smem:[#allocation5 + $0x2]]  ;;  %v424_v39 = vmul.f32 %v989_v5, %v293_v23 }
  0x51   : > { %v296_v32 = vrot.slane %v294_v25, 1  ;;  %v308_v33 = vmul.f32 %v307_v31, %v985_v3  ;;  %s1022_s26 = sld [smem:[#allocation3 + $0x180]]  ;;  %v407_v34 = vadd.f32 %v405_v19, %v400_v27  ;;  %v421_v43 = vmul.f32 %v989_v5, %v290_v18 }
  0x52   : > { %v284_v36 = vadd.f32 %v282_v22, %v277_v28  ;;  %v303_v37 = vrot.slane %v301_v30, 2  ;;  %v318_v38 = vstv %s1002_s10  ;;  %s1025_s27 = sld [smem:[#allocation3 + $0x181]]  ;;  %v314_v49 = vstv %s997_s9 }
  0x53   : > { %v298_v40 = vadd.f32 %v296_v32, %v291_v24  ;;  %v310_v41 = vrot.slane %v308_v33, 3  ;;  %v321_v42 = vstv %s1005_s11  ;;  %s1029_s20 = sld [smem:[#allocation3 + $0x182]]  ;;  %v319_v45 = vmul.f32 %v318_v38, %v985_v3 }
  0x54   : > { %v1032_v44 = vadd.f32 %v286_v29, %v284_v36  ;;  %v322_v46 = vmul.f32 %v321_v42, %v985_v3  ;;  %v328_v47 = vstv %s1009_s17  ;;  %s1037_s29 = sld [smem:[#allocation3 + $0x183]]  ;;  %v414_v54 = vadd.f32 %v412_v35, %v407_v34 }
  0x55   : > { %v305_v48 = vadd.f32 %v303_v37, %v298_v40  ;;  %v329_v50 = vmul.f32 %v328_v47, %v985_v3  ;;  %v335_v51 = vstv %s1014_s19  ;;  %s1042_s24 = sld [smem:[#allocation5 + $0x3]]  ;;  %v426_v55 = vrot.slane %v424_v39, 1 }
  0x56   : > { %v324_v52 = vrot.slane %v322_v46, 1  ;;  %v336_v53 = vmul.f32 %v335_v51, %v985_v3  ;;  %v288_v56 = vmax.f32 %v1032_v44, 0.0  ;;  %v342_v62 = vstv %s1019_s21 }
  0x57   : > { %v312_v57 = vadd.f32 %v310_v41, %v305_v48  ;;  %v331_v58 = vrot.slane %v329_v50, 2  ;;  %v346_v59 = vstv %s1022_s26  ;;  %v417_v9 = vadd.f32 %v414_v54, %v286_v29 }
  0x58   : > { %v326_v60 = vadd.f32 %v324_v52, %v319_v45  ;;  %v338_v61 = vrot.slane %v336_v53, 3  ;;  %v349_v63 = vstv %s1025_s27  ;;  %v347_v1 = vmul.f32 %v346_v59, %v985_v3 }
  0x59   : > { %v315_v0 = vadd.f32 %v314_v49, %v312_v57  ;;  %v350_v2 = vmul.f32 %v349_v63, %v985_v3  ;;  %v356_v4 = vstv %s1029_s20  ;;  %v428_v13 = vadd.f32 %v426_v55, %v421_v43 }
  0x5a   : > { %v333_v6 = vadd.f32 %v331_v58, %v326_v60  ;;  %v357_v7 = vmul.f32 %v356_v4, %v985_v3  ;;  %v363_v8 = vstv %s1037_s29  ;;  %v431_v16 = vmul.f32 %v989_v5, %v300_v26 }
  0x5b   : > { %v316_v10 = vmax.f32 %v315_v0, 0.0  ;;  %v352_v11 = vrot.slane %v350_v2, 1  ;;  %v364_v12 = vmul.f32 %v363_v8, %v985_v3  ;;  %v438_v17 = vmul.f32 %v989_v5, %v307_v31 }
  0x5c   : > { %v340_v14 = vadd.f32 %v338_v61, %v333_v6  ;;  %v359_v15 = vrot.slane %v357_v7, 2  ;;  %v370_v20 = vstv %s1042_s24  ;;  %v449_v21 = vmul.f32 %v989_v5, %v318_v38 }
  0x5d   : > { %v354_v18 = vadd.f32 %v352_v11, %v347_v1  ;;  %v366_v19 = vrot.slane %v364_v12, 3  ;;  %v433_v23 = vrot.slane %v431_v16, 2  ;;  %v440_v24 = vrot.slane %v438_v17, 3 }
  0x5e   : > { %v343_v22 = vadd.f32 %v342_v62, %v340_v14  ;;  %v452_v25 = vmul.f32 %v989_v5, %v321_v42  ;;  %v374_v3 = vrot.slane %v316_v10, 7  ;;  %v459_v28 = vmul.f32 %v989_v5, %v328_v47 }
  0x5f   : > { %v361_v27 = vadd.f32 %v359_v15, %v354_v18  ;;  %v466_v29 = vmul.f32 %v989_v5, %v335_v51  ;;  %v435_v26 = vadd.f32 %v433_v23, %v428_v13  ;;  %v477_v31 = vmul.f32 %v989_v5, %v346_v59 }
  0x60   : > { %v344_v30 = vmax.f32 %v343_v22, 0.0  ;;  %v454_v32 = vrot.slane %v452_v25, 1  ;;  %v461_v34 = vrot.slane %v459_v28, 2  ;;  %v480_v36 = vmul.f32 %v989_v5, %v349_v63 }
  0x61   : > { %v368_v33 = vadd.f32 %v366_v19, %v361_v27  ;;  %v468_v35 = vrot.slane %v466_v29, 3  ;;  %v442_v38 = vadd.f32 %v440_v24, %v435_v26  ;;  %v487_v40 = vmul.f32 %v989_v5, %v356_v4 }
  0x62   : > { %v377_v37 = vrot.slane %v344_v30, 6  ;;  %v456_v39 = vadd.f32 %v454_v32, %v449_v21  ;;  %v383_v42 = vsel %vm382_vm0, %v288_v56, %v374_v3  ;;  %v482_v43 = vrot.slane %v480_v36, 1 }
  0x63   : > { %v371_v41 = vadd.f32 %v370_v20, %v368_v33  ;;  %v494_v44 = vmul.f32 %v989_v5, %v363_v8  ;;  %v445_v45 = vadd.f32 %v442_v38, %v314_v49  ;;  %v489_v47 = vrot.slane %v487_v40, 2 }
  0x64   : > { %v463_v46 = vadd.f32 %v461_v34, %v456_v39  ;;  %v484_v50 = vadd.f32 %v482_v43, %v477_v31  ;;  %v385_v52 = vsel %vm384_vm1, %v383_v42, %v377_v37  ;;  %v418_v57 = vmax.f32 %v417_v9, 0.0 }
  0x65   : > { %v372_v48 = vmax.f32 %v371_v41, 0.0  ;;  %v496_v51 = vrot.slane %v494_v44, 3  ;;  %v446_v53 = vmax.f32 %v445_v45, 0.0 }
  0x66   : > { %v470_v54 = vadd.f32 %v468_v35, %v463_v46  ;;  %v491_v58 = vadd.f32 %v489_v47, %v484_v50 }
  0x67   : > { %v380_v55 = vrot.slane %v372_v48, 5  ;;  %v504_v56 = vrot.slane %v446_v53, 7 }
  0x68   : > { %v473_v59 = vadd.f32 %v470_v54, %v342_v62  ;;  %v498_v5 = vadd.f32 %v496_v51, %v491_v58 }
  0x69   : > { %v387_v60 = vsel %vm386_vm2, %v385_v52, %v380_v55  ;;  %v512_v63 = vsel %vm382_vm0, %v418_v57, %v504_v56 }
  0x6a   : > { %388 = vst [vmem:[%s257_s30] sm:$0xf] %v387_v60  ;;  %v474_v49 = vmax.f32 %v473_v59, 0.0  ;;  %v501_v61 = vadd.f32 %v498_v5, %v370_v20 }
  0x6c   : > { %v507_v0 = vrot.slane %v474_v49, 6  ;;  %v502_v1 = vmax.f32 %v501_v61, 0.0 }
  0x6d   : > { %523 = sbr.rel (!%p1109_p9) target bundleno = 122 (0x7a), region = 85 }
  0x6e   : > { %v513_v2 = vsel %vm384_vm1, %v512_v63, %v507_v0  ;;  %v510_v4 = vrot.slane %v502_v1, 5 }
  0x70   : > { %v514_v6 = vsel %vm386_vm2, %v513_v2, %v510_v4 }
  0x71   : > { %715 = vst [vmem:[%s257_s30 + $0x4] sm:$0xf] %v514_v6  ;;  %v545_v62 = vld [vmem:[%s257_s30] sm:$0xf] (%p1109_p9) }
  0x72   : > { %546 = vst [vmem:[%s528_s5] sm:$0xf] %v545_v62 }
  0x78   : > { %v547_v7 = vld [vmem:[%s257_s30 + $0x4] sm:$0xf] }
  0x79   : > { %548 = vst [vmem:[%s528_s5 + $0x8] sm:$0xf] %v547_v7 }
  0x7a PF: > { %s15_s16 = sadd.s32 1, %s857_s16   ;;  %s1110_s12 = smov %s845_s13 }
  0x7b   : > { %p12_p10 = scmp.ge.s32.totalorder %s15_s16, 4   ;;  %s1111_s13 = smov %s927_s23 }
  0x7c   : > { %s1112_s14 = smov %s853_s15  ;;  %s1113_s15 = smov %s1115_s18 }
  0x7d   :  { %14 = sbr.rel (!%p12_p10) target bundleno = 4 (0x4), region = 160 }
  0x82   :  { %586 = vsyncpa [#allocation4], 1 }
  0x83   :  { %588 = vsyncpa [#allocation4 + $0x1], 1 }
  0x84   :  { %589 = vsyncpa [#allocation6], 1 }

</bundles_post_ra>
